<compile_context>
chip_gen: v6e
topology: v6e:2x2x1
jax: 0.10.0
libtpu: 0.0.40
codegen_flags: <defaults>
</compile_context>

<pallas_src>
import functools

import jax
import jax.numpy as jnp
from jax.experimental import pallas as pl
from jax.experimental.pallas import tpu as pltpu

SUBLANE = 8
MAX_TILE_B = 1024  # big tile -> step overhead amortized; payload still << VMEM


def _round_up(x: int, m: int) -> int:
    return ((x + m - 1) // m) * m


def policy_net_kernel(x_ref, w1_ref, b1_ref, w2_ref, b2_ref, w3_ref, b3_ref,
                      out_ref):
    # Layer 1: Linear + ReLU
    h1 = jnp.dot(x_ref[...], w1_ref[...],
                 preferred_element_type=jnp.float32) + b1_ref[...]
    h1 = jnp.maximum(h1, 0.0)

    # Layer 2: Linear + ReLU
    h2 = jnp.dot(h1, w2_ref[...],
                 preferred_element_type=jnp.float32) + b2_ref[...]
    h2 = jnp.maximum(h2, 0.0)

    # Layer 3: Linear -> logits
    logits = jnp.dot(h2, w3_ref[...],
                     preferred_element_type=jnp.float32) + b3_ref[...]

    # Softmax over dim=1 (action dimension), numerically stabilized.
    # Exact divide (not approx reciprocal): kernel is DMA-bound, and exact
    # normalization keeps rows summing to 1 to f32 accuracy.
    m = jnp.max(logits, axis=1, keepdims=True)
    e = jnp.exp(logits - m)
    denom = jnp.sum(e, axis=1, keepdims=True)
    out_ref[...] = e / denom


@functools.partial(jax.jit, static_argnames=("max_tile_b",))
def policy_network_forward(x, params, *, max_tile_b: int = MAX_TILE_B):
    """Full forward pass of Policy_Network in one Pallas call.

    x: (B, obs_dims) array (cast to float32, mirrors x.float()).
    params: dict with w1 (obs,h), b1 (1,h), w2 (h,h), b2 (1,h),
            w3 (h,a), b3 (1,a) — all float32.
    Returns: (B, action_dims) float32 probabilities (rows sum to 1).
    """
    x = x.astype(jnp.float32)
    B, obs = x.shape
    A = params["w3"].shape[1]

    # Batch tile: large enough to amortize per-step overhead, but no larger
    # than round_up(B, 8) so tiny batches are a single cheap grid step.
    # No jnp.pad of x: Pallas masks the ragged final block itself.
    tile_b = min(max_tile_b, _round_up(B, SUBLANE))
    grid = (pl.cdiv(B, tile_b),)

    def pinned(arr):  # weights/biases: full block, VMEM-resident across steps
        return pl.BlockSpec(arr.shape, lambda i: (0, 0))

    out = pl.pallas_call(
        policy_net_kernel,
        out_shape=jax.ShapeDtypeStruct((B, A), jnp.float32),
        grid=grid,
        in_specs=[
            pl.BlockSpec((tile_b, obs), lambda i: (i, 0)),   # x: batch-tiled
            pinned(params["w1"]), pinned(params["b1"]),
            pinned(params["w2"]), pinned(params["b2"]),
            pinned(params["w3"]), pinned(params["b3"]),
        ],
        out_specs=pl.BlockSpec((tile_b, A), lambda i: (i, 0)),
        compiler_params=pltpu.CompilerParams(
            dimension_semantics=("parallel",)),
    )(x, params["w1"], params["b1"], params["w2"], params["b2"],
      params["w3"], params["b3"])

    return out


def reference_forward(x, params):
    """Plain-JAX reference mirroring the PyTorch module."""
    x = x.astype(jnp.float32)
    h1 = jnp.maximum(x @ params["w1"] + params["b1"], 0.0)
    h2 = jnp.maximum(h1 @ params["w2"] + params["b2"], 0.0)
    logits = h2 @ params["w3"] + params["b3"]
    return jax.nn.softmax(logits, axis=1)


def init_params(key, obs_dims, hidden_dims, action_dims):
    """Deterministic init mimicking torch.nn.Linear default U[-1/sqrt(in), 1/sqrt(in)]."""
    ks = jax.random.split(key, 6)

    def linear(kw, kb, fan_in, fan_out):
        bound = 1.0 / jnp.sqrt(fan_in)
        w = jax.random.uniform(kw, (fan_in, fan_out), jnp.float32, -bound, bound)
        b = jax.random.uniform(kb, (1, fan_out), jnp.float32, -bound, bound)
        return w, b

    w1, b1 = linear(ks[0], ks[1], obs_dims, hidden_dims)
    w2, b2 = linear(ks[2], ks[3], hidden_dims, hidden_dims)
    w3, b3 = linear(ks[4], ks[5], hidden_dims, action_dims)
    return {"w1": w1, "b1": b1, "w2": w2, "b2": b2, "w3": w3, "b3": b3}


if __name__ == "__main__":
    obs_space_dims = 16
    hidden_dims = 32
    action_space_dims = 8
    batch = 8

    key = jax.random.PRNGKey(0)
    k_params, k_x = jax.random.split(key)
    params = init_params(k_params, obs_space_dims, hidden_dims, action_space_dims)
    x = jax.random.normal(k_x, (batch, obs_space_dims), jnp.float32)

    out = jax.block_until_ready(policy_network_forward(x, params))
    ref = reference_forward(x, params)

    assert out.shape == (batch, action_space_dims)
    # Tolerance absorbs any matmul-precision difference between the Mosaic
    # f32 MXU path and XLA's default-precision reference matmuls.
    assert jnp.allclose(out, ref, atol=2e-3), "mismatch vs reference"
    assert jnp.allclose(jnp.sum(out, axis=1), 1.0, atol=1e-5), "rows must sum to 1"

    # Multi-step + ragged-final-block path (B=515 with a 256-row tile).
    k_big = jax.random.PRNGKey(1)
    xb = jax.random.normal(k_big, (515, obs_space_dims), jnp.float32)
    ob = jax.block_until_ready(policy_network_forward(xb, params, max_tile_b=256))
    refb = reference_forward(xb, params)
    assert ob.shape == (515, action_space_dims)
    assert jnp.allclose(ob, refb, atol=2e-3), "mismatch vs reference (tiled/ragged)"
    assert jnp.allclose(jnp.sum(ob, axis=1), 1.0, atol=1e-5)

    print("KERNEL_OK")
</pallas_src>

<mosaic_0001>
module attributes {stable_mosaic.version = 11 : i64} {
  func.func @policy_net_kernel(%arg0: i32, %arg1: memref<8x16xf32, #tpu.memory_space<vmem>>, %arg2: memref<16x32xf32, #tpu.memory_space<vmem>>, %arg3: memref<1x32xf32, #tpu.memory_space<vmem>>, %arg4: memref<32x32xf32, #tpu.memory_space<vmem>>, %arg5: memref<1x32xf32, #tpu.memory_space<vmem>>, %arg6: memref<32x8xf32, #tpu.memory_space<vmem>>, %arg7: memref<1x8xf32, #tpu.memory_space<vmem>>, %arg8: memref<8x8xf32, #tpu.memory_space<vmem>>) attributes {dimension_semantics = [#tpu.dimension_semantics<parallel>], iteration_bounds = array<i64: 1>, scalar_prefetch = 0 : i64, scratch_operands = 0 : i64, tpu.core_type = #tpu.core_type<tc>, window_params = [{transform_indices = @transform_0, window_bounds = array<i64: 8, 16>}, {pipeline_mode = #tpu.pipeline_mode<synchronous>, transform_indices = @transform_1, window_bounds = array<i64: 16, 32>}, {pipeline_mode = #tpu.pipeline_mode<synchronous>, transform_indices = @transform_2, window_bounds = array<i64: 1, 32>}, {pipeline_mode = #tpu.pipeline_mode<synchronous>, transform_indices = @transform_3, window_bounds = array<i64: 32, 32>}, {pipeline_mode = #tpu.pipeline_mode<synchronous>, transform_indices = @transform_4, window_bounds = array<i64: 1, 32>}, {pipeline_mode = #tpu.pipeline_mode<synchronous>, transform_indices = @transform_5, window_bounds = array<i64: 32, 8>}, {pipeline_mode = #tpu.pipeline_mode<synchronous>, transform_indices = @transform_6, window_bounds = array<i64: 1, 8>}, {transform_indices = @transform_7, window_bounds = array<i64: 8, 8>}]} {
    %c0 = arith.constant 0 : index
    %c0_0 = arith.constant 0 : index
    %0 = vector.load %arg1[%c0, %c0_0] : memref<8x16xf32, #tpu.memory_space<vmem>>, vector<8x16xf32>
    %c0_1 = arith.constant 0 : index
    %c0_2 = arith.constant 0 : index
    %1 = vector.load %arg2[%c0_1, %c0_2] : memref<16x32xf32, #tpu.memory_space<vmem>>, vector<16x32xf32>
    %cst = arith.constant dense<0.000000e+00> : vector<8x32xf32>
    %2 = tpu.matmul %0, %1, %cst {dimension_numbers = #tpu.dot_dimension_numbers<[1], [0], [0], [1], [0, 0, 1, 1], [], []>} : vector<8x16xf32>, vector<16x32xf32>, vector<8x32xf32> -> vector<8x32xf32>
    %c0_3 = arith.constant 0 : index
    %c0_4 = arith.constant 0 : index
    %3 = vector.load %arg3[%c0_3, %c0_4] : memref<1x32xf32, #tpu.memory_space<vmem>>, vector<1x32xf32>
    %4 = vector.broadcast %3 : vector<1x32xf32> to vector<8x32xf32>
    %5 = arith.addf %2, %4 : vector<8x32xf32>
    %cst_5 = arith.constant 0.000000e+00 : f32
    %6 = vector.broadcast %cst_5 : f32 to vector<8x32xf32>
    %7 = arith.maximumf %5, %6 : vector<8x32xf32>
    %c0_6 = arith.constant 0 : index
    %c0_7 = arith.constant 0 : index
    %8 = vector.load %arg4[%c0_6, %c0_7] : memref<32x32xf32, #tpu.memory_space<vmem>>, vector<32x32xf32>
    %cst_8 = arith.constant dense<0.000000e+00> : vector<8x32xf32>
    %9 = tpu.matmul %7, %8, %cst_8 {dimension_numbers = #tpu.dot_dimension_numbers<[1], [0], [0], [1], [0, 0, 1, 1], [], []>} : vector<8x32xf32>, vector<32x32xf32>, vector<8x32xf32> -> vector<8x32xf32>
    %c0_9 = arith.constant 0 : index
    %c0_10 = arith.constant 0 : index
    %10 = vector.load %arg5[%c0_9, %c0_10] : memref<1x32xf32, #tpu.memory_space<vmem>>, vector<1x32xf32>
    %11 = vector.broadcast %10 : vector<1x32xf32> to vector<8x32xf32>
    %12 = arith.addf %9, %11 : vector<8x32xf32>
    %cst_11 = arith.constant 0.000000e+00 : f32
    %13 = vector.broadcast %cst_11 : f32 to vector<8x32xf32>
    %14 = arith.maximumf %12, %13 : vector<8x32xf32>
    %c0_12 = arith.constant 0 : index
    %c0_13 = arith.constant 0 : index
    %15 = vector.load %arg6[%c0_12, %c0_13] : memref<32x8xf32, #tpu.memory_space<vmem>>, vector<32x8xf32>
    %cst_14 = arith.constant dense<0.000000e+00> : vector<8x8xf32>
    %16 = tpu.matmul %14, %15, %cst_14 {dimension_numbers = #tpu.dot_dimension_numbers<[1], [0], [0], [1], [0, 0, 1, 1], [], []>} : vector<8x32xf32>, vector<32x8xf32>, vector<8x8xf32> -> vector<8x8xf32>
    %c0_15 = arith.constant 0 : index
    %c0_16 = arith.constant 0 : index
    %17 = vector.load %arg7[%c0_15, %c0_16] : memref<1x8xf32, #tpu.memory_space<vmem>>, vector<1x8xf32>
    %18 = vector.broadcast %17 : vector<1x8xf32> to vector<8x8xf32>
    %19 = arith.addf %16, %18 : vector<8x8xf32>
    %cst_17 = arith.constant dense<0xFF800000> : vector<8xf32>
    %20 = vector.multi_reduction <maximumf>, %19, %cst_17 [1] : vector<8x8xf32> to vector<8xf32>
    %21 = vector.shape_cast %20 : vector<8xf32> to vector<8x1xf32>
    %22 = vector.broadcast %21 : vector<8x1xf32> to vector<8x8xf32>
    %23 = arith.subf %19, %22 : vector<8x8xf32>
    %24 = math.exp %23 : vector<8x8xf32>
    %cst_18 = arith.constant dense<0.000000e+00> : vector<8xf32>
    %25 = vector.multi_reduction <add>, %24, %cst_18 [1] : vector<8x8xf32> to vector<8xf32>
    %26 = vector.shape_cast %25 : vector<8xf32> to vector<8x1xf32>
    %27 = vector.broadcast %26 : vector<8x1xf32> to vector<8x8xf32>
    %28 = arith.divf %24, %27 : vector<8x8xf32>
    %c0_19 = arith.constant 0 : index
    %c0_20 = arith.constant 0 : index
    %29 = vector.load %arg8[%c0_19, %c0_20] : memref<8x8xf32, #tpu.memory_space<vmem>>, vector<8x8xf32>
    tpu.vector_store %arg8[%c0_19, %c0_20], %28 {strides = array<i32>} : memref<8x8xf32, #tpu.memory_space<vmem>>, vector<8x8xf32>,
    return
  }
  func.func @transform_0(%arg0: i32) -> (i32, i32) {
    %c0_i32 = arith.constant 0 : i32
    %c0_i32_0 = arith.constant 0 : i32
    return %arg0, %c0_i32 : i32, i32
  }
  func.func @transform_1(%arg0: i32) -> (i32, i32) {
    %c0_i32 = arith.constant 0 : i32
    %c0_i32_0 = arith.constant 0 : i32
    %c0_i32_1 = arith.constant 0 : i32
    return %c0_i32, %c0_i32_0 : i32, i32
  }
  func.func @transform_2(%arg0: i32) -> (i32, i32) {
    %c0_i32 = arith.constant 0 : i32
    %c0_i32_0 = arith.constant 0 : i32
    %c0_i32_1 = arith.constant 0 : i32
    return %c0_i32, %c0_i32_0 : i32, i32
  }
  func.func @transform_3(%arg0: i32) -> (i32, i32) {
    %c0_i32 = arith.constant 0 : i32
    %c0_i32_0 = arith.constant 0 : i32
    %c0_i32_1 = arith.constant 0 : i32
    return %c0_i32, %c0_i32_0 : i32, i32
  }
  func.func @transform_4(%arg0: i32) -> (i32, i32) {
    %c0_i32 = arith.constant 0 : i32
    %c0_i32_0 = arith.constant 0 : i32
    %c0_i32_1 = arith.constant 0 : i32
    return %c0_i32, %c0_i32_0 : i32, i32
  }
  func.func @transform_5(%arg0: i32) -> (i32, i32) {
    %c0_i32 = arith.constant 0 : i32
    %c0_i32_0 = arith.constant 0 : i32
    %c0_i32_1 = arith.constant 0 : i32
    return %c0_i32, %c0_i32_0 : i32, i32
  }
  func.func @transform_6(%arg0: i32) -> (i32, i32) {
    %c0_i32 = arith.constant 0 : i32
    %c0_i32_0 = arith.constant 0 : i32
    %c0_i32_1 = arith.constant 0 : i32
    return %c0_i32, %c0_i32_0 : i32, i32
  }
  func.func @transform_7(%arg0: i32) -> (i32, i32) {
    %c0_i32 = arith.constant 0 : i32
    %c0_i32_0 = arith.constant 0 : i32
    return %arg0, %c0_i32 : i32, i32
  }
}

</mosaic_0001>

<bundles_post_ra>
// kernel: policy_network_forward.1
= control target key start
LH: loop header
LB: loop body
LE: loop exit
PB: predicated region body
PF: predicated region fallthrough
CT: control target
= control target key end

     0   :  { %12 = vsyncpa [#allocation3], 0  ;;  %s589_s0 = inlined_call_operand.hbm [shape: f32[8,16], index: 0, kind: input, shape index: {}]   ;;  %s590_s1 = inlined_call_operand.vmem [shape: f32[16,32], index: 1, kind: input, shape index: {}]   ;;  %s591_s2 = inlined_call_operand.vmem [shape: f32[1,32], index: 2, kind: input, shape index: {}]   ;;  %s592_s3 = inlined_call_operand.vmem [shape: f32[32,32], index: 3, kind: input, shape index: {}]   ;;  %s593_s4 = inlined_call_operand.hbm [shape: f32[1,32], index: 4, kind: input, shape index: {}]   ;;  %s594_s5 = inlined_call_operand.vmem [shape: f32[32,8], index: 5, kind: input, shape index: {}]   ;;  %s595_s6 = inlined_call_operand.hbm [shape: f32[1,8], index: 6, kind: input, shape index: {}]   ;;  %s596_s7 = inlined_call_operand.hbm [shape: f32[8,8], index: 7, kind: output, shape index: {}]  }
   0x1   :  { %13 = vsyncpa [#allocation6], 0 }
   0x2   :  { %14 = vsyncpa [#allocation4], 0  ;;  %s490_s24 = smov [#allocation5]   ;;  %s491_s26 = smov [#allocation2]  }
   0x3   :  { %s37_s25 = sshll.u32 %s490_s24, 4  ;;  %s21_s27 = sshll.u32 %s491_s26, 4  ;;  %s38_s25 = int_to_ptr.vmem [resolvable:$true] %s37_s25  ;;  %s22_s27 = int_to_ptr.vmem [resolvable:$true] %s21_s27 }
   0x4   :  { %s412_s28 = scalar_lea.vmem %s38_s25, 16  ;;  %s416_s29 = scalar_lea.vmem %s38_s25, 32 }
   0x5   :  { %p413_p0 = scmp.ne.s32.totalorder %s38_s25, %s412_s28  ;;  %p417_p1 = scmp.lt.s32.totalorder %s38_s25, %s38_s25 }
   0x6   :  { %p418_p2 = scmp.lt.s32.totalorder %s416_s29, %s412_s28 }
   0x8   :  { %p419_p3 = por %p418_p2, %p417_p1 }
   0xa   :  { %p420_p4 = pnand %p419_p3, %p413_p0 }
   0xc   :  { %423 = shalt.err (!%p420_p4)
}
   0xd   :  { %40 = dma.hbm_to_vmem [thread:$0]  %s593_s4, 16, %s38_s25, [#allocation6]  }
   0xe   :  { %s432_s9 = scalar_lea.vmem %s22_s27, 128  ;;  %p437_p6 = scmp.lt.s32.totalorder %s22_s27, %s22_s27 }
   0xf   :  { %p433_p5 = scmp.ne.s32.totalorder %s22_s27, %s432_s9  ;;  %p438_p7 = scmp.lt.s32.totalorder %s432_s9, %s432_s9 }
  0x11   :  { %p439_p8 = por %p438_p7, %p437_p6 }
  0x13   :  { %p440_p9 = pnand %p439_p8, %p433_p5 }
  0x15   :  { %443 = shalt.err (!%p440_p9)
}
  0x16   :  { %24 = dma.hbm_to_vmem [thread:$0]  %s589_s0, 128, %s22_s27, [#allocation3]  }
  0x17   :  { %s492_s12 = smov [#allocation7]  }
  0x18   :  { %s49_s13 = sshll.u32 %s492_s12, 4  ;;  %s50_s13 = int_to_ptr.vmem [resolvable:$true] %s49_s13 }
  0x19   :  { %s452_s14 = scalar_lea.vmem %s50_s13, 16  ;;  %s456_s15 = scalar_lea.vmem %s50_s13, 32 }
  0x1a   :  { %p453_p10 = scmp.ne.s32.totalorder %s50_s13, %s452_s14  ;;  %p457_p11 = scmp.lt.s32.totalorder %s50_s13, %s50_s13 }
  0x1b   :  { %p458_p12 = scmp.lt.s32.totalorder %s456_s15, %s452_s14 }
  0x1d   :  { %p459_p13 = por %p458_p12, %p457_p11 }
  0x1f   :  { %p460_p0 = pnand %p459_p13, %p453_p10 }
  0x21   :  { %463 = shalt.err (!%p460_p0)
}
  0x22   :  { %52 = dma.hbm_to_vmem [thread:$0]  %s595_s6, 16, %s50_s13, [#allocation6]  }
  0x23   :  { %484 = dma.done.wait [#allocation3], 128  }
  0x24   :  { %485 = vsyncadd [#allocation3], 4294967168 }
  0x25   :  { %486 = dma.done.wait [#allocation6], 32  }
  0x26   :  { %487 = vsyncadd [#allocation6], 4294967264  ;;  %v493_v0 = vmov 0.0   ;;  %vm494_vm0 = vmmov 0   ;;  %v64_v1 = vld [vmem:[%s590_s1 + $0x8] sm:$0xff]  ;;  %v63_v2 = vld [vmem:[%s590_s1] sm:$0xff] }
  0x27   :  { %365 = vmatprep.subr.mxu0 %v493_v0  ;;  %369 = vmatprep.mubr.msk.f32.mxu0 %vm494_vm0, %v493_v0  ;;  %v62_v3 = vld [vmem:[#allocation2] sm:$0xff]  ;;  %vm72_vm1 = vcmask 130048   ;;  %v150_v4 = vld [vmem:[%s592_s3 + $0x18] sm:$0xff]  ;;  %v149_v5 = vld [vmem:[%s592_s3 + $0x10] sm:$0xff]  ;;  %vm158_vm2 = vcmask 261120   ;;  %vm317_vm3 = vcmask 64512  }
  0x28   :  { %372 = vmatprep.subr.mxu1 %v493_v0  ;;  %380 = vmatprep.mubr.msk.f32.mxu1 %vm494_vm0, %v493_v0  ;;  %v148_v6 = vld [vmem:[%s592_s3 + $0x8] sm:$0xff]  ;;  %v147_v7 = vld [vmem:[%s592_s3] sm:$0xff]  ;;  %v236_v8 = vld [vmem:[%s594_s5 + $0x18] sm:$0xff] }
  0x29   :  { %366 = vmatpush3.msra.mxu0 %v64_v1  ;;  %373 = vmatpush3.msra.mxu1 %v150_v4  ;;  %v346_v9 = vld [vmem:[%s591_s2] ss:$0 sm:$0xff]  ;;  %v235_v14 = vld [vmem:[%s594_s5 + $0x10] sm:$0xff]  ;;  %v234_v15 = vld [vmem:[%s594_s5 + $0x8] sm:$0xff] }
  0x2a   :  { %367 = vmatprep.subr.mxu0 %v493_v0  ;;  %374 = vmatprep.subr.mxu1 %v493_v0  ;;  %v233_v16 = vld [vmem:[%s594_s5] sm:$0xff]  ;;  %v348_v17 = vld [vmem:[#allocation5] ss:$0 sm:$0xff]  ;;  %v350_v22 = vld [vmem:[#allocation7] ss:$0 sm:$0xff]  ;;  %s495_s5 = smov [#allocation8]  }
  0x2b   :  { %368 = vmatpush3.msra.mxu0 %v63_v2  ;;  %375 = vmatpush3.msra.mxu1 %v149_v5  ;;  %s336_s11 = sshll.u32 %s495_s5, 4  ;;  %s337_s11 = int_to_ptr.vmem [resolvable:$true] %s336_s11 }
  0x2c   :  { %370 = vmatmul.mubr.msk.f32.vlgmr.msra.gmra.mxu0 %vm72_vm1, %v62_v3  ;;  %383 = vmatprep.subr.mxu0 %v493_v0  ;;  %s464_s12 = scalar_lea.vmem %s337_s11, 128  ;;  %p469_p2 = scmp.lt.s32.totalorder %s337_s11, %s337_s11 }
  0x2d   :  { %391 = vmatprep.mubr.msk.f32.mxu0 %vm494_vm0, %v493_v0  ;;  %376 = vmatprep.subr.mxu1 %v493_v0  ;;  %p465_p1 = scmp.ne.s32.totalorder %s337_s11, %s464_s12  ;;  %p470_p3 = scmp.lt.s32.totalorder %s464_s12, %s464_s12 }
  0x2e   :  { %377 = vmatpush3.msra.mxu1 %v148_v6  ;;  %384 = vmatpush3.msra.mxu0 %v236_v8 }
  0x2f   :  { %378 = vmatprep.subr.mxu1 %v493_v0  ;;  %385 = vmatprep.subr.mxu0 %v493_v0  ;;  %p471_p4 = por %p470_p3, %p469_p2 }
  0x30   :  { %379 = vmatpush3.msra.mxu1 %v147_v7  ;;  %386 = vmatpush3.msra.mxu0 %v235_v14 }
  0x31   :  { %387 = vmatprep.subr.mxu0 %v493_v0  ;;  %p472_p5 = pnand %p471_p4, %p465_p1 }
  0x32   :  { %388 = vmatpush3.msra.mxu0 %v234_v15 }
  0x33   :  { %389 = vmatprep.subr.mxu0 %v493_v0 }
  0x34   :  { %390 = vmatpush3.msra.mxu0 %v233_v16 }
  0xec   :  { %v142_v10 = vpop.f32.mrf.mxu0 }
  0xed   :  { %v143_v11 = vadd.f32 %v346_v9, %v142_v10 }
  0xee   :  { %v371_v12 = vpop.f32.mrf.mxu0 }
  0xef   :  { %v146_v13 = vmax.f32 %v143_v11, 0.0 }
  0xf1   :  { %381 = vmatmul.mubr.msk.f32.vlgmr.msra.gmra.mxu1 %vm158_vm2, %v146_v13 }
 0x1b1   :  { %v228_v18 = vpop.f32.mrf.mxu1 }
 0x1b2   :  { %v229_v19 = vadd.f32 %v348_v17, %v228_v18 }
 0x1b3   :  { %v382_v20 = vpop.f32.mrf.mxu1 }
 0x1b4   :  { %v232_v21 = vmax.f32 %v229_v19, 0.0 }
 0x1b6   :  { %392 = vmatmul.mubr.msk.f32.vlgmr.msra.gmra.mxu0 %vm158_vm2, %v232_v21 }
 0x276   :  { %v313_v23 = vpop.f32.mrf.mxu0 }
 0x277   :  { %v314_v24 = vadd.f32 %v350_v22, %v313_v23 }
 0x278   :  { %v393_v25 = vpop.f32.mrf.mxu0 }
 0x279   :  { %v318_v26 = vsel %vm317_vm3, %v314_v24, -inf }
 0x27a   :  { %319 = vmax.xlane.f32.xlu0 %v318_v26 }
 0x303   :  { %v320_v27 = vpop.xlane.xlu0 %319 }
 0x304   :  { %v321_v28 = vsub.f32 %v314_v24, %v320_v27 }
 0x306   :  { %v322_v29 = vmul.f32 1.442695, %v321_v28 }
 0x308   :  { %400 = vpow2.f32 %v322_v29 }
 0x315   :  { %v401_v30 = vpop.eup %400 }
 0x316   :  { %v324_v31 = vsel %vm317_vm3, %v401_v30, 0.0 }
 0x317   :  { %325 = vadd.xlane.f32.xlu0 %v324_v31 }
 0x3a0   :  { %v326_v32 = vpop.xlane.xlu0 %325 }
 0x3a1   :  { %402 = vrcp.f32 %v326_v32 }
 0x3ae   :  { %v403_v33 = vpop.eup %402 }
 0x3af   :  { %v328_v34 = vmul.f32 %v403_v33, %v401_v30 }
 0x3b1   :  { %329 = vst.msk [vmem:[#allocation8] sm:$0xff] %vm317_vm3, %v328_v34 }
 0x3b2   :  { %475 = shalt.err (!%p472_p5)
}
 0x3b3   :  { %339 = dma.vmem_to_hbm [thread:$0]  %s337_s11, 128, %s596_s7, [#allocation4]  }
 0x3b4   :  { %488 = dma.done.wait [#allocation4], 128  }
 0x3b5   :  { %489 = vsyncadd [#allocation4], 4294967168 }
 0x3b6   :  { %343 = vsyncpa [#allocation3], 1 }
 0x3b7   :  { %344 = vsyncpa [#allocation6], 1 }
 0x3b8   :  { %345 = vsyncpa [#allocation4], 1 }

</bundles_post_ra>
